<compile_context>
chip_gen: v6e
topology: v6e:2x2x1
jax: 0.10.0
libtpu: 0.0.40
codegen_flags: <defaults>
</compile_context>

<pallas_src>
import functools

import jax
import jax.numpy as jnp
import numpy as np
from jax import lax
from jax.experimental import pallas as pl
from jax.experimental.pallas import tpu as pltpu


# ---------------------------------------------------------------------------
# Model structure (pytorch_net style struct_param)
# ---------------------------------------------------------------------------
ENCODER_STRUCT_PARAM = [
    [4, "Conv2d", {"kernel_size": 3, "stride": 2, "padding": 1, "activation": "relu"}],
    [8, "Conv2d", {"kernel_size": 3, "stride": 2, "padding": 1, "activation": "relu"}],
]
DECODER_STRUCT_PARAM = [
    [4, "ConvTranspose2d", {"kernel_size": 4, "stride": 2, "padding": 1, "activation": "relu"}],
    [1, "ConvTranspose2d", {"kernel_size": 4, "stride": 2, "padding": 1, "activation": "sigmoid"}],
]
IMG_HW = 16
ENC_HIDDEN_SHAPE = (8, 4, 4)                       # (C, H, W) after two stride-2 convs
ENC_FLATTEN_SIZE = int(np.prod(ENC_HIDDEN_SHAPE))  # 128
LATENT_SIZE = (1, 2)
LATENT_FLAT = int(np.prod(LATENT_SIZE))            # 2

# activation per fused layer: conv1, conv2, (enc_fully∘dec_fully), deconv1, deconv2
_FUSED_ACTIVATIONS = ("relu", "relu", "linear", "relu", "sigmoid")

# Batch tile: multiple of 8, fills MXU rows on v5e (128) and v6e/v7x (256),
# keeps the live (TB, 256) f32 activation chain spill-free and well under
# VMEM limits on all generations.
_BATCH_TILE = 256


def _round_up(x, m):
    return ((x + m - 1) // m) * m


# ---------------------------------------------------------------------------
# Parameter init (PyTorch-style uniform(+-1/sqrt(fan_in)))
# ---------------------------------------------------------------------------
def init_params(key):
    def u(k, shape, fan_in):
        bound = 1.0 / np.sqrt(fan_in)
        return jax.random.uniform(k, shape, minval=-bound, maxval=bound,
                                  dtype=jnp.float32)

    keys = jax.random.split(key, 12)
    params = {}

    # Encoder convs: Conv2d weight layout (OC, IC, KH, KW); fan_in = IC*k*k.
    in_ch, enc = 1, []
    for i, (oc, _, st) in enumerate(ENCODER_STRUCT_PARAM):
        k = st["kernel_size"]
        fan = in_ch * k * k
        enc.append((u(keys[2 * i], (oc, in_ch, k, k), fan),
                    u(keys[2 * i + 1], (oc,), fan)))
        in_ch = oc
    params["encoder"] = enc

    # Decoder transposed convs: weight layout (IC, OC, KH, KW);
    # PyTorch fan_in = weight.size(1)*k*k = OC*k*k.
    dec_in, dec = ENCODER_STRUCT_PARAM[-1][0], []
    for i, (oc, _, st) in enumerate(DECODER_STRUCT_PARAM):
        k = st["kernel_size"]
        fan = oc * k * k
        dec.append((u(keys[4 + 2 * i], (dec_in, oc, k, k), fan),
                    u(keys[4 + 2 * i + 1], (oc,), fan)))
        dec_in = oc
    params["decoder"] = dec

    # Linear layers stored transposed as (in_features, out_features).
    params["enc_fully"] = (u(keys[8], (ENC_FLATTEN_SIZE, LATENT_FLAT), ENC_FLATTEN_SIZE),
                           u(keys[9], (LATENT_FLAT,), ENC_FLATTEN_SIZE))
    params["dec_fully"] = (u(keys[10], (LATENT_FLAT, ENC_FLATTEN_SIZE), LATENT_FLAT),
                           u(keys[11], (ENC_FLATTEN_SIZE,), LATENT_FLAT))
    return params


# ---------------------------------------------------------------------------
# One-time parameter preparation: fold each (transposed) conv into an exact
# dense operator on (h, w, c)-flattened activations.  Pure numpy, exact copies
# of weight values (no arithmetic), done once outside the hot path.
# ---------------------------------------------------------------------------
def _conv_as_dense(w, b, H, W, stride, padding, transpose):
    w_np = np.asarray(w, np.float32)
    b_np = np.asarray(b, np.float32)
    if transpose:
        IC, OC, KH, KW = w_np.shape
        OH = (H - 1) * stride - 2 * padding + KH
        OW = (W - 1) * stride - 2 * padding + KW
    else:
        OC, IC, KH, KW = w_np.shape
        OH = (H + 2 * padding - KH) // stride + 1
        OW = (W + 2 * padding - KW) // stride + 1

    M = np.zeros((H * W * IC, OH * OW * OC), np.float32)
    for oh in range(OH):
        for ow in range(OW):
            for kh in range(KH):
                for kw in range(KW):
                    if transpose:
                        # out[oh,ow,oc] += x[ih,iw,ic] * w[ic,oc,kh,kw],
                        # oh = ih*s - p + kh
                        dh, dw = oh + padding - kh, ow + padding - kw
                        if dh % stride or dw % stride:
                            continue
                        ih, iw = dh // stride, dw // stride
                    else:
                        # out[oh,ow,oc] += x[oh*s+kh-p, ow*s+kw-p, ic]*w[oc,ic,kh,kw]
                        ih = oh * stride + kh - padding
                        iw = ow * stride + kw - padding
                    if not (0 <= ih < H and 0 <= iw < W):
                        continue
                    ib = (ih * W + iw) * IC
                    ob = (oh * OW + ow) * OC
                    blk = w_np[:, :, kh, kw] if transpose else w_np[:, :, kh, kw].T
                    M[ib:ib + IC, ob:ob + OC] += blk     # (IC, OC) block
    b_full = np.tile(b_np, OH * OW)                       # (oh, ow, oc) order
    return M, b_full, OH, OW


def prepare_fused_params(params):
    """Returns a flat tuple (m1, b1, ..., m5, b5).

    Matrices (bfloat16) act on (h, w, c)-flattened activations; biases are
    (1, width) float32.  The PyTorch NCHW flatten order around the FC layers
    is folded into the FC weights, and the two linear FC layers are folded
    into a single exact 128x128 matrix (m34 = m3 @ m4, b34 = b3 @ m4 + b4),
    so the kernel needs no padding, slicing or transposes and runs only five
    matmul steps."""
    mats = []

    # Encoder convs.
    H = W = IMG_HW
    for (w, b), (_, _, st) in zip(params["encoder"], ENCODER_STRUCT_PARAM):
        M, bf, H, W = _conv_as_dense(w, b, H, W, st["stride"], st["padding"],
                                     transpose=False)
        mats.append((M, bf))

    # FC layers: NCHW-flatten permutation folded into the weights, then the
    # two linear layers folded into one dense (128, 128) operator (exact:
    # both activations are 'linear').
    C, Hh, Ww = ENC_HIDDEN_SHAPE
    perm = np.array([c * Hh * Ww + h * Ww + w
                     for h in range(Hh) for w in range(Ww) for c in range(C)])
    w_ef = np.asarray(params["enc_fully"][0], np.float64)   # (128, 2)
    b_ef = np.asarray(params["enc_fully"][1], np.float64)   # (2,)
    w_df = np.asarray(params["dec_fully"][0], np.float64)   # (2, 128)
    b_df = np.asarray(params["dec_fully"][1], np.float64)   # (128,)
    m3 = w_ef[perm, :]                                       # hwc-flattened input
    m4 = w_df[:, perm]                                       # hwc-flattened output
    b4 = b_df[perm]
    m34 = m3 @ m4                                            # (128, 128)
    b34 = b_ef @ m4 + b4                                     # (128,)
    mats.append((m34, b34))

    # Decoder transposed convs.
    H = W = Hh
    for (w, b), (_, _, st) in zip(params["decoder"], DECODER_STRUCT_PARAM):
        M, bf, H, W = _conv_as_dense(w, b, H, W, st["stride"], st["padding"],
                                     transpose=True)
        mats.append((M, bf))

    flat = []
    for m, bb in mats:
        # bf16 weights halve HBM bytes / double MXU throughput (f32 accum in
        # the kernel via preferred_element_type).  Biases stay f32.
        flat.append(jnp.asarray(np.asarray(m, np.float32), jnp.bfloat16))
        flat.append(jnp.reshape(jnp.asarray(np.asarray(bb, np.float32)), (1, -1)))
    return tuple(flat)


# ---------------------------------------------------------------------------
# The fused Pallas kernel: five matmul + bias + activation steps per batch
# tile; weights stay VMEM-resident across the whole grid.
# ---------------------------------------------------------------------------
def _fused_autoencoder_kernel(x_ref, *refs, activations):
    o_ref = refs[-1]
    h = x_ref[...]                                   # (TB, 256) f32
    for i, act in enumerate(activations):
        m = refs[2 * i][...]                         # (K, N) bf16, K,N mult. of 128
        bias = refs[2 * i + 1][...]                  # (1, N) f32 -> row broadcast
        h = jnp.dot(h.astype(m.dtype), m,
                    preferred_element_type=jnp.float32) + bias
        if act == "relu":
            h = jnp.maximum(h, 0.0)                  # VPU
        elif act == "sigmoid":
            h = jax.nn.sigmoid(h)                    # EUP (free VLIW slot)
        elif act != "linear":
            raise ValueError(f"unknown activation {act}")
    o_ref[...] = h.astype(o_ref.dtype)


@jax.jit
def conv_autoencoder_forward(x_nchw, fused_ops):
    """Forward pass: encode -> latent -> decode.  x_nchw: (N, 1, 16, 16)."""
    assert x_nchw.shape[1] == 1, x_nchw.shape
    n = x_nchw.shape[0]
    in_dim = IMG_HW * IMG_HW                         # 256
    out_dim = fused_ops[-2].shape[1]                 # 16*16*1 = 256

    # With C == 1 the NCHW flatten is just (h, w) -> a plain reshape.
    x_flat = x_nchw.astype(jnp.float32).reshape(n, in_dim)

    # Batch tile: pad to a multiple of 8 (tiny batches -> one tile) or to a
    # multiple of _BATCH_TILE for larger batches (gridded + pipelined).
    n8 = _round_up(n, 8)
    if n8 <= _BATCH_TILE:
        tb, n_pad = n8, n8
    else:
        tb, n_pad = _BATCH_TILE, _round_up(n, _BATCH_TILE)
    if n_pad != n:
        x_flat = jnp.pad(x_flat, ((0, n_pad - n), (0, 0)))

    # Input/output activations: tiled over batch.  Weights/biases: full-shape
    # constant-index blocks -> DMA'd into VMEM once, resident across the grid.
    x_spec = pl.BlockSpec((tb, in_dim), lambda i: (i, 0))
    w_specs = [pl.BlockSpec(arr.shape, lambda i: (0, 0)) for arr in fused_ops]
    out_spec = pl.BlockSpec((tb, out_dim), lambda i: (i, 0))

    flops_per_row = 2 * sum(int(fused_ops[2 * j].shape[0] * fused_ops[2 * j].shape[1])
                            for j in range(len(_FUSED_ACTIVATIONS)))
    weight_bytes = sum(int(a.size) * a.dtype.itemsize for a in fused_ops)
    cost = pl.CostEstimate(
        flops=int(n_pad) * flops_per_row,
        transcendentals=int(n_pad) * int(out_dim),            # final sigmoid
        bytes_accessed=weight_bytes + int(n_pad) * (in_dim + out_dim) * 4,
    )

    out_flat = pl.pallas_call(
        functools.partial(_fused_autoencoder_kernel, activations=_FUSED_ACTIVATIONS),
        out_shape=jax.ShapeDtypeStruct((n_pad, out_dim), jnp.float32),
        grid=(n_pad // tb,),
        in_specs=[x_spec] + w_specs,
        out_specs=out_spec,
        compiler_params=pltpu.CompilerParams(
            dimension_semantics=("parallel",)),                # dual-TC on v7x
        cost_estimate=cost,
    )(x_flat, *fused_ops)
    return out_flat[:n].reshape(n, 1, IMG_HW, IMG_HW)


# ---------------------------------------------------------------------------
# Pure-JAX reference with the ORIGINAL per-layer conv structure (im2col +
# dilated transposed conv), used only for correctness checking.
# ---------------------------------------------------------------------------
def _ref_linear(x, w, b, activation):
    acc = jnp.dot(x.astype(jnp.float32), w.astype(jnp.float32),
                  precision=lax.Precision.HIGHEST) + b.astype(jnp.float32)
    if activation == "relu":
        acc = jnp.maximum(acc, 0.0)
    elif activation == "sigmoid":
        acc = jax.nn.sigmoid(acc)
    return acc


def _ref_conv2d_nhwc(x, w, b, stride, padding, activation):
    N, H, W, C = x.shape
    OC, IC, KH, KW = w.shape
    out_h = (H + 2 * padding - KH) // stride + 1
    out_w = (W + 2 * padding - KW) // stride + 1
    xp = jnp.pad(x, ((0, 0), (padding, padding), (padding, padding), (0, 0)))
    patches = []
    for kh in range(KH):
        for kw in range(KW):
            patches.append(xp[:, kh:kh + out_h * stride:stride,
                              kw:kw + out_w * stride:stride, :])
    pm = jnp.concatenate(patches, axis=-1).reshape(N * out_h * out_w, KH * KW * C)
    wm = jnp.transpose(w, (2, 3, 1, 0)).reshape(KH * KW * IC, OC)
    return _ref_linear(pm, wm, b, activation).reshape(N, out_h, out_w, OC)


def _ref_conv_transpose2d_nhwc(x, w, b, stride, padding, activation):
    N, H, W, C = x.shape
    IC, OC, KH, KW = w.shape
    Hd, Wd = (H - 1) * stride + 1, (W - 1) * stride + 1
    xd = jnp.zeros((N, Hd, Wd, C), x.dtype).at[:, ::stride, ::stride, :].set(x)
    w_conv = jnp.transpose(w[:, :, ::-1, ::-1], (1, 0, 2, 3))   # (OC, IC, KH, KW)
    return _ref_conv2d_nhwc(xd, w_conv, b, stride=1, padding=KH - 1 - padding,
                            activation=activation)


def conv_autoencoder_forward_ref(x_nchw, params):
    h = jnp.transpose(x_nchw, (0, 2, 3, 1)).astype(jnp.float32)          # NHWC
    for (w, b), (_, _, st) in zip(params["encoder"], ENCODER_STRUCT_PARAM):
        h = _ref_conv2d_nhwc(h, w, b, st["stride"], st["padding"], st["activation"])
    enc_hidden_nchw = jnp.transpose(h, (0, 3, 1, 2))
    enc_hidden_size = enc_hidden_nchw.shape[1:]
    enc_flat = enc_hidden_nchw.reshape(enc_hidden_nchw.shape[0], -1)
    latent = _ref_linear(enc_flat, *params["enc_fully"], "linear")
    dec_flat = _ref_linear(latent, *params["dec_fully"], "linear")
    h = jnp.transpose(dec_flat.reshape(-1, *enc_hidden_size), (0, 2, 3, 1))
    for (w, b), (_, _, st) in zip(params["decoder"], DECODER_STRUCT_PARAM):
        h = _ref_conv_transpose2d_nhwc(h, w, b, st["stride"], st["padding"],
                                       st["activation"])
    return jnp.transpose(h, (0, 3, 1, 2))


if __name__ == "__main__":
    key = jax.random.PRNGKey(0)
    k_params, k_in_small, k_in_big = jax.random.split(key, 3)
    params = init_params(k_params)
    fused_ops = prepare_fused_params(params)       # once, outside the hot path

    # bf16 weights in the kernel -> relaxed tolerance vs. the f32 reference.
    TOL = 3e-2

    # Small batch (single tile).
    x = jax.random.normal(k_in_small, (2, 1, IMG_HW, IMG_HW), dtype=jnp.float32)
    out = jax.block_until_ready(conv_autoencoder_forward(x, fused_ops))
    assert out.shape == (2, 1, IMG_HW, IMG_HW), out.shape
    ref = jax.block_until_ready(conv_autoencoder_forward_ref(x, params))
    np.testing.assert_allclose(np.asarray(out), np.asarray(ref), rtol=TOL, atol=TOL)

    # Larger batch (exercises the batch grid / pipelined tiles + padding).
    xb = jax.random.normal(k_in_big, (300, 1, IMG_HW, IMG_HW), dtype=jnp.float32)
    outb = jax.block_until_ready(conv_autoencoder_forward(xb, fused_ops))
    assert outb.shape == (300, 1, IMG_HW, IMG_HW), outb.shape
    refb = jax.block_until_ready(conv_autoencoder_forward_ref(xb, params))
    np.testing.assert_allclose(np.asarray(outb), np.asarray(refb), rtol=TOL, atol=TOL)

    print("KERNEL_OK")
</pallas_src>

<mosaic_0001>
module attributes {stable_mosaic.version = 11 : i64} {
  func.func @_fused_autoencoder_kernel(%arg0: i32, %arg1: memref<8x256xf32, #tpu.memory_space<vmem>>, %arg2: memref<256x256xbf16, #tpu.memory_space<vmem>>, %arg3: memref<1x256xf32, #tpu.memory_space<vmem>>, %arg4: memref<256x128xbf16, #tpu.memory_space<vmem>>, %arg5: memref<1x128xf32, #tpu.memory_space<vmem>>, %arg6: memref<128x128xbf16, #tpu.memory_space<vmem>>, %arg7: memref<1x128xf32, #tpu.memory_space<vmem>>, %arg8: memref<128x256xbf16, #tpu.memory_space<vmem>>, %arg9: memref<1x256xf32, #tpu.memory_space<vmem>>, %arg10: memref<256x256xbf16, #tpu.memory_space<vmem>>, %arg11: memref<1x256xf32, #tpu.memory_space<vmem>>, %arg12: memref<8x256xf32, #tpu.memory_space<vmem>>) attributes {dimension_semantics = [#tpu.dimension_semantics<parallel>], iteration_bounds = array<i64: 1>, scalar_prefetch = 0 : i64, scratch_operands = 0 : i64, tpu.core_type = #tpu.core_type<tc>, window_params = [{transform_indices = @transform_0, window_bounds = array<i64: 8, 256>}, {pipeline_mode = #tpu.pipeline_mode<synchronous>, transform_indices = @transform_1, window_bounds = array<i64: 256, 256>}, {pipeline_mode = #tpu.pipeline_mode<synchronous>, transform_indices = @transform_2, window_bounds = array<i64: 1, 256>}, {pipeline_mode = #tpu.pipeline_mode<synchronous>, transform_indices = @transform_3, window_bounds = array<i64: 256, 128>}, {pipeline_mode = #tpu.pipeline_mode<synchronous>, transform_indices = @transform_4, window_bounds = array<i64: 1, 128>}, {pipeline_mode = #tpu.pipeline_mode<synchronous>, transform_indices = @transform_5, window_bounds = array<i64: 128, 128>}, {pipeline_mode = #tpu.pipeline_mode<synchronous>, transform_indices = @transform_6, window_bounds = array<i64: 1, 128>}, {pipeline_mode = #tpu.pipeline_mode<synchronous>, transform_indices = @transform_7, window_bounds = array<i64: 128, 256>}, {pipeline_mode = #tpu.pipeline_mode<synchronous>, transform_indices = @transform_8, window_bounds = array<i64: 1, 256>}, {pipeline_mode = #tpu.pipeline_mode<synchronous>, transform_indices = @transform_9, window_bounds = array<i64: 256, 256>}, {pipeline_mode = #tpu.pipeline_mode<synchronous>, transform_indices = @transform_10, window_bounds = array<i64: 1, 256>}, {transform_indices = @transform_11, window_bounds = array<i64: 8, 256>}]} {
    %c0 = arith.constant 0 : index
    %c0_0 = arith.constant 0 : index
    %0 = vector.load %arg1[%c0, %c0_0] : memref<8x256xf32, #tpu.memory_space<vmem>>, vector<8x256xf32>
    %c0_1 = arith.constant 0 : index
    %c0_2 = arith.constant 0 : index
    %1 = vector.load %arg2[%c0_1, %c0_2] : memref<256x256xbf16, #tpu.memory_space<vmem>>, vector<256x256xbf16>
    %c0_3 = arith.constant 0 : index
    %c0_4 = arith.constant 0 : index
    %2 = vector.load %arg3[%c0_3, %c0_4] : memref<1x256xf32, #tpu.memory_space<vmem>>, vector<1x256xf32>
    %3 = arith.truncf %0 : vector<8x256xf32> to vector<8x256xbf16>
    %cst = arith.constant dense<0.000000e+00> : vector<8x256xf32>
    %4 = tpu.matmul %3, %1, %cst {dimension_numbers = #tpu.dot_dimension_numbers<[1], [0], [0], [1], [0, 0, 1, 1], [], []>} : vector<8x256xbf16>, vector<256x256xbf16>, vector<8x256xf32> -> vector<8x256xf32>
    %5 = vector.broadcast %2 : vector<1x256xf32> to vector<8x256xf32>
    %6 = arith.addf %4, %5 : vector<8x256xf32>
    %cst_5 = arith.constant 0.000000e+00 : f32
    %7 = vector.broadcast %cst_5 : f32 to vector<8x256xf32>
    %8 = arith.maximumf %6, %7 : vector<8x256xf32>
    %c0_6 = arith.constant 0 : index
    %c0_7 = arith.constant 0 : index
    %9 = vector.load %arg4[%c0_6, %c0_7] : memref<256x128xbf16, #tpu.memory_space<vmem>>, vector<256x128xbf16>
    %c0_8 = arith.constant 0 : index
    %c0_9 = arith.constant 0 : index
    %10 = vector.load %arg5[%c0_8, %c0_9] : memref<1x128xf32, #tpu.memory_space<vmem>>, vector<1x128xf32>
    %11 = arith.truncf %8 : vector<8x256xf32> to vector<8x256xbf16>
    %cst_10 = arith.constant dense<0.000000e+00> : vector<8x128xf32>
    %12 = tpu.matmul %11, %9, %cst_10 {dimension_numbers = #tpu.dot_dimension_numbers<[1], [0], [0], [1], [0, 0, 1, 1], [], []>} : vector<8x256xbf16>, vector<256x128xbf16>, vector<8x128xf32> -> vector<8x128xf32>
    %13 = vector.broadcast %10 : vector<1x128xf32> to vector<8x128xf32>
    %14 = arith.addf %12, %13 : vector<8x128xf32>
    %cst_11 = arith.constant 0.000000e+00 : f32
    %15 = vector.broadcast %cst_11 : f32 to vector<8x128xf32>
    %16 = arith.maximumf %14, %15 : vector<8x128xf32>
    %c0_12 = arith.constant 0 : index
    %c0_13 = arith.constant 0 : index
    %17 = vector.load %arg6[%c0_12, %c0_13] : memref<128x128xbf16, #tpu.memory_space<vmem>>, vector<128x128xbf16>
    %c0_14 = arith.constant 0 : index
    %c0_15 = arith.constant 0 : index
    %18 = vector.load %arg7[%c0_14, %c0_15] : memref<1x128xf32, #tpu.memory_space<vmem>>, vector<1x128xf32>
    %19 = arith.truncf %16 : vector<8x128xf32> to vector<8x128xbf16>
    %cst_16 = arith.constant dense<0.000000e+00> : vector<8x128xf32>
    %20 = tpu.matmul %19, %17, %cst_16 {dimension_numbers = #tpu.dot_dimension_numbers<[1], [0], [0], [1], [0, 0, 1, 1], [], []>} : vector<8x128xbf16>, vector<128x128xbf16>, vector<8x128xf32> -> vector<8x128xf32>
    %21 = vector.broadcast %18 : vector<1x128xf32> to vector<8x128xf32>
    %22 = arith.addf %20, %21 : vector<8x128xf32>
    %c0_17 = arith.constant 0 : index
    %c0_18 = arith.constant 0 : index
    %23 = vector.load %arg8[%c0_17, %c0_18] : memref<128x256xbf16, #tpu.memory_space<vmem>>, vector<128x256xbf16>
    %c0_19 = arith.constant 0 : index
    %c0_20 = arith.constant 0 : index
    %24 = vector.load %arg9[%c0_19, %c0_20] : memref<1x256xf32, #tpu.memory_space<vmem>>, vector<1x256xf32>
    %25 = arith.truncf %22 : vector<8x128xf32> to vector<8x128xbf16>
    %cst_21 = arith.constant dense<0.000000e+00> : vector<8x256xf32>
    %26 = tpu.matmul %25, %23, %cst_21 {dimension_numbers = #tpu.dot_dimension_numbers<[1], [0], [0], [1], [0, 0, 1, 1], [], []>} : vector<8x128xbf16>, vector<128x256xbf16>, vector<8x256xf32> -> vector<8x256xf32>
    %27 = vector.broadcast %24 : vector<1x256xf32> to vector<8x256xf32>
    %28 = arith.addf %26, %27 : vector<8x256xf32>
    %cst_22 = arith.constant 0.000000e+00 : f32
    %29 = vector.broadcast %cst_22 : f32 to vector<8x256xf32>
    %30 = arith.maximumf %28, %29 : vector<8x256xf32>
    %c0_23 = arith.constant 0 : index
    %c0_24 = arith.constant 0 : index
    %31 = vector.load %arg10[%c0_23, %c0_24] : memref<256x256xbf16, #tpu.memory_space<vmem>>, vector<256x256xbf16>
    %c0_25 = arith.constant 0 : index
    %c0_26 = arith.constant 0 : index
    %32 = vector.load %arg11[%c0_25, %c0_26] : memref<1x256xf32, #tpu.memory_space<vmem>>, vector<1x256xf32>
    %33 = arith.truncf %30 : vector<8x256xf32> to vector<8x256xbf16>
    %cst_27 = arith.constant dense<0.000000e+00> : vector<8x256xf32>
    %34 = tpu.matmul %33, %31, %cst_27 {dimension_numbers = #tpu.dot_dimension_numbers<[1], [0], [0], [1], [0, 0, 1, 1], [], []>} : vector<8x256xbf16>, vector<256x256xbf16>, vector<8x256xf32> -> vector<8x256xf32>
    %35 = vector.broadcast %32 : vector<1x256xf32> to vector<8x256xf32>
    %36 = arith.addf %34, %35 : vector<8x256xf32>
    %37 = arith.negf %36 : vector<8x256xf32>
    %38 = math.exp %37 : vector<8x256xf32>
    %cst_28 = arith.constant 1.000000e+00 : f32
    %39 = vector.broadcast %cst_28 : f32 to vector<8x256xf32>
    %40 = arith.addf %39, %38 : vector<8x256xf32>
    %41 = arith.divf %39, %40 : vector<8x256xf32>
    %c0_29 = arith.constant 0 : index
    %c0_30 = arith.constant 0 : index
    %42 = vector.load %arg12[%c0_29, %c0_30] : memref<8x256xf32, #tpu.memory_space<vmem>>, vector<8x256xf32>
    tpu.vector_store %arg12[%c0_29, %c0_30], %41 {strides = array<i32>} : memref<8x256xf32, #tpu.memory_space<vmem>>, vector<8x256xf32>,
    return
  }
  func.func @transform_0(%arg0: i32) -> (i32, i32) {
    %c0_i32 = arith.constant 0 : i32
    %c0_i32_0 = arith.constant 0 : i32
    return %arg0, %c0_i32 : i32, i32
  }
  func.func @transform_1(%arg0: i32) -> (i32, i32) {
    %c0_i32 = arith.constant 0 : i32
    %c0_i32_0 = arith.constant 0 : i32
    %c0_i32_1 = arith.constant 0 : i32
    return %c0_i32, %c0_i32_0 : i32, i32
  }
  func.func @transform_2(%arg0: i32) -> (i32, i32) {
    %c0_i32 = arith.constant 0 : i32
    %c0_i32_0 = arith.constant 0 : i32
    %c0_i32_1 = arith.constant 0 : i32
    return %c0_i32, %c0_i32_0 : i32, i32
  }
  func.func @transform_3(%arg0: i32) -> (i32, i32) {
    %c0_i32 = arith.constant 0 : i32
    %c0_i32_0 = arith.constant 0 : i32
    %c0_i32_1 = arith.constant 0 : i32
    return %c0_i32, %c0_i32_0 : i32, i32
  }
  func.func @transform_4(%arg0: i32) -> (i32, i32) {
    %c0_i32 = arith.constant 0 : i32
    %c0_i32_0 = arith.constant 0 : i32
    %c0_i32_1 = arith.constant 0 : i32
    return %c0_i32, %c0_i32_0 : i32, i32
  }
  func.func @transform_5(%arg0: i32) -> (i32, i32) {
    %c0_i32 = arith.constant 0 : i32
    %c0_i32_0 = arith.constant 0 : i32
    %c0_i32_1 = arith.constant 0 : i32
    return %c0_i32, %c0_i32_0 : i32, i32
  }
  func.func @transform_6(%arg0: i32) -> (i32, i32) {
    %c0_i32 = arith.constant 0 : i32
    %c0_i32_0 = arith.constant 0 : i32
    %c0_i32_1 = arith.constant 0 : i32
    return %c0_i32, %c0_i32_0 : i32, i32
  }
  func.func @transform_7(%arg0: i32) -> (i32, i32) {
    %c0_i32 = arith.constant 0 : i32
    %c0_i32_0 = arith.constant 0 : i32
    %c0_i32_1 = arith.constant 0 : i32
    return %c0_i32, %c0_i32_0 : i32, i32
  }
  func.func @transform_8(%arg0: i32) -> (i32, i32) {
    %c0_i32 = arith.constant 0 : i32
    %c0_i32_0 = arith.constant 0 : i32
    %c0_i32_1 = arith.constant 0 : i32
    return %c0_i32, %c0_i32_0 : i32, i32
  }
  func.func @transform_9(%arg0: i32) -> (i32, i32) {
    %c0_i32 = arith.constant 0 : i32
    %c0_i32_0 = arith.constant 0 : i32
    %c0_i32_1 = arith.constant 0 : i32
    return %c0_i32, %c0_i32_0 : i32, i32
  }
  func.func @transform_10(%arg0: i32) -> (i32, i32) {
    %c0_i32 = arith.constant 0 : i32
    %c0_i32_0 = arith.constant 0 : i32
    %c0_i32_1 = arith.constant 0 : i32
    return %c0_i32, %c0_i32_0 : i32, i32
  }
  func.func @transform_11(%arg0: i32) -> (i32, i32) {
    %c0_i32 = arith.constant 0 : i32
    %c0_i32_0 = arith.constant 0 : i32
    return %arg0, %c0_i32 : i32, i32
  }
}

</mosaic_0001>

<bundles_post_ra>
// kernel: conv_autoencoder_forward.1
= control target key start
LH: loop header
LB: loop body
LE: loop exit
PB: predicated region body
PF: predicated region fallthrough
CT: control target
= control target key end

     0   :  { %16 = vsyncpa [#allocation3], 0  ;;  %s1649_s0 = inlined_call_operand.vmem [shape: f32[8,256], index: 0, kind: input, shape index: {}]   ;;  %s1650_s1 = inlined_call_operand.hbm [shape: bf16[256,256], index: 1, kind: input, shape index: {}]   ;;  %s1651_s2 = inlined_call_operand.vmem [shape: f32[1,256], index: 2, kind: input, shape index: {}]   ;;  %s1652_s3 = inlined_call_operand.hbm [shape: bf16[256,128], index: 3, kind: input, shape index: {}]   ;;  %s1653_s4 = inlined_call_operand.hbm [shape: f32[1,128], index: 4, kind: input, shape index: {}]   ;;  %s1654_s5 = inlined_call_operand.vmem [shape: bf16[128,128], index: 5, kind: input, shape index: {}]   ;;  %s1655_s6 = inlined_call_operand.vmem [shape: f32[1,128], index: 6, kind: input, shape index: {}]   ;;  %s1656_s7 = inlined_call_operand.hbm [shape: bf16[128,256], index: 7, kind: input, shape index: {}]   ;;  %s1657_s8 = inlined_call_operand.vmem [shape: f32[1,256], index: 8, kind: input, shape index: {}]   ;;  %s1658_s9 = inlined_call_operand.hbm [shape: bf16[256,256], index: 9, kind: input, shape index: {}]   ;;  %s1659_s10 = inlined_call_operand.vmem [shape: f32[1,256], index: 10, kind: input, shape index: {}]   ;;  %s1660_s11 = inlined_call_operand.vmem [shape: f32[8,256], index: 11, kind: output, shape index: {}]  }
   0x1   :  { %17 = vsyncpa [#allocation5], 0 }
   0x2   :  { %18 = vsyncpa [#allocation8], 0  ;;  %s1495_s17 = smov [#allocation4]  }
   0x3   :  { %s40_s18 = sshll.u32 %s1495_s17, 4  ;;  %s41_s18 = int_to_ptr.vmem [resolvable:$true] %s40_s18 }
   0x4   :  { %s1397_s19 = scalar_lea.vmem %s41_s18, 2048  ;;  %p1402_p1 = scmp.lt.s32.totalorder %s41_s18, %s41_s18 }
   0x5   :  { %p1398_p0 = scmp.ne.s32.totalorder %s41_s18, %s1397_s19  ;;  %p1403_p2 = scmp.lt.s32.totalorder %s1397_s19, %s1397_s19 }
   0x7   :  { %p1404_p3 = por %p1403_p2, %p1402_p1 }
   0x9   :  { %p1405_p4 = pnand %p1404_p3, %p1398_p0 }
   0xb   :  { %1408 = shalt.err (!%p1405_p4)
}
   0xc   :  { %s1496_s20 = smov 64   ;;  %s1497_s21 = smov 4  }
   0xd   :  { %46 = dma.hbm_to_vmem [thread:$0]  %s1652_s3, 2048, %s41_s18, [#allocation5], %s1496_s20, %s1496_s20, %s1497_s21  }
   0xe   :  { %s1498_s24 = smov [#allocation7]   ;;  %s1499_s26 = smov [#allocation2]  }
   0xf   :  { %s66_s25 = sshll.u32 %s1498_s24, 4  ;;  %s26_s27 = sshll.u32 %s1499_s26, 4  ;;  %s67_s25 = int_to_ptr.vmem [resolvable:$true] %s66_s25  ;;  %s27_s27 = int_to_ptr.vmem [resolvable:$true] %s26_s27 }
  0x10   :  { %s1417_s28 = scalar_lea.vmem %s67_s25, 2048  ;;  %p1422_p6 = scmp.lt.s32.totalorder %s67_s25, %s67_s25 }
  0x11   :  { %p1418_p5 = scmp.ne.s32.totalorder %s67_s25, %s1417_s28  ;;  %p1423_p7 = scmp.lt.s32.totalorder %s1417_s28, %s1417_s28 }
  0x13   :  { %p1424_p8 = por %p1423_p7, %p1422_p6 }
  0x15   :  { %p1425_p9 = pnand %p1424_p8, %p1418_p5 }
  0x17   :  { %1428 = shalt.err (!%p1425_p9)
}
  0x18   :  { %s1500_s29 = smov 128   ;;  %s1501_s30 = smov 8  }
  0x19   :  { %72 = dma.hbm_to_vmem [thread:$0]  %s1656_s7, 2048, %s67_s25, [#allocation8], %s1500_s29, %s1500_s29, %s1501_s30  }
  0x1a   :  { %s1437_s3 = scalar_lea.vmem %s27_s27, 4096  ;;  %p1442_p11 = scmp.lt.s32.totalorder %s27_s27, %s27_s27 }
  0x1b   :  { %p1438_p10 = scmp.ne.s32.totalorder %s27_s27, %s1437_s3  ;;  %p1443_p12 = scmp.lt.s32.totalorder %s1437_s3, %s1437_s3 }
  0x1d   :  { %p1444_p13 = por %p1443_p12, %p1442_p11 }
  0x1f   :  { %p1445_p0 = pnand %p1444_p13, %p1438_p10 }
  0x21   :  { %1448 = shalt.err (!%p1445_p0)
}
  0x22   :  { %32 = dma.hbm_to_vmem [thread:$0]  %s1650_s1, 4096, %s27_s27, [#allocation3], %s1500_s29, %s1500_s29, %s1501_s30  }
  0x23   :  { %s1502_s16 = smov [#allocation6]   ;;  %s1503_s18 = smov [#allocation9]  }
  0x24   :  { %s53_s17 = sshll.u32 %s1502_s16, 4  ;;  %s80_s7 = sshll.u32 %s1503_s18, 4  ;;  %s54_s17 = int_to_ptr.vmem [resolvable:$true] %s53_s17  ;;  %s81_s7 = int_to_ptr.vmem [resolvable:$true] %s80_s7 }
  0x25   :  { %s1457_s19 = scalar_lea.vmem %s54_s17, 16  ;;  %s1461_s20 = scalar_lea.vmem %s54_s17, 32 }
  0x26   :  { %p1458_p1 = scmp.ne.s32.totalorder %s54_s17, %s1457_s19  ;;  %p1462_p2 = scmp.lt.s32.totalorder %s54_s17, %s54_s17 }
  0x27   :  { %p1463_p3 = scmp.lt.s32.totalorder %s1461_s20, %s1457_s19 }
  0x29   :  { %p1464_p4 = por %p1463_p3, %p1462_p2 }
  0x2b   :  { %p1465_p5 = pnand %p1464_p4, %p1458_p1 }
  0x2d   :  { %1468 = shalt.err (!%p1465_p5)
}
  0x2e   :  { %56 = dma.hbm_to_vmem [thread:$0]  %s1653_s4, 16, %s54_s17, [#allocation5]  }
  0x2f   :  { %s1477_s23 = scalar_lea.vmem %s81_s7, 4096  ;;  %p1482_p7 = scmp.lt.s32.totalorder %s81_s7, %s81_s7 }
  0x30   :  { %p1478_p6 = scmp.ne.s32.totalorder %s81_s7, %s1477_s23  ;;  %p1483_p8 = scmp.lt.s32.totalorder %s1477_s23, %s1477_s23 }
  0x32   :  { %p1484_p9 = por %p1483_p8, %p1482_p7 }
  0x34   :  { %p1485_p10 = pnand %p1484_p9, %p1478_p6 }
  0x36   :  { %1488 = shalt.err (!%p1485_p10)
}
  0x37   :  { %86 = dma.hbm_to_vmem [thread:$0]  %s1658_s9, 4096, %s81_s7, [#allocation8], %s1500_s29, %s1500_s29, %s1501_s30  }
  0x38   :  { %1489 = dma.done.wait [#allocation3], 4096  }
  0x39   :  { %1490 = vsyncadd [#allocation3], 4294963200 }
  0x3a   :  { %1491 = dma.done.wait [#allocation5], 2064  }
  0x3b   :  { %1492 = vsyncadd [#allocation5], 4294965232 }
  0x3c   :  { %1493 = dma.done.wait [#allocation8], 6144  }
  0x3d   :  { %1494 = vsyncadd [#allocation8], 4294961152  ;;  %v1237_v0 = vld [vmem:[#allocation2 + $0x74] ss:$8 sps:$4 sm:$0xff]   ;;  %v1239_v1 = vld [vmem:[#allocation2 + $0x70] ss:$8 sps:$4 sm:$0xff]   ;;  %v143_v53 = vlaneseq }
  0x3e   :  { %313 = vmatprep.subr.bf16.mxu0 %v1237_v0  ;;  %v1240_v2 = vld [vmem:[#allocation2 + $0x64] ss:$8 sps:$4 sm:$0xff]   ;;  %v1242_v3 = vld [vmem:[#allocation2 + $0x60] ss:$8 sps:$4 sm:$0xff]   ;;  %v1243_v4 = vld [vmem:[#allocation2 + $0x54] ss:$8 sps:$4 sm:$0xff]  }
  0x3f   :  { %314 = vmatpush1.bf16.msra.mxu0 %v1239_v1  ;;  %v1245_v5 = vld [vmem:[#allocation2 + $0x50] ss:$8 sps:$4 sm:$0xff]   ;;  %v1246_v6 = vld [vmem:[#allocation2 + $0x44] ss:$8 sps:$4 sm:$0xff]   ;;  %v1248_v7 = vld [vmem:[#allocation2 + $0x40] ss:$8 sps:$4 sm:$0xff]  }
  0x40   :  { %315 = vmatprep.subr.bf16.mxu0 %v1240_v2  ;;  %v1249_v8 = vld [vmem:[#allocation2 + $0x34] ss:$8 sps:$4 sm:$0xff]   ;;  %v1251_v9 = vld [vmem:[#allocation2 + $0x30] ss:$8 sps:$4 sm:$0xff]   ;;  %v1252_v10 = vld [vmem:[#allocation2 + $0x24] ss:$8 sps:$4 sm:$0xff]  }
  0x41   :  { %v1254_v11 = vld [vmem:[#allocation2 + $0x20] ss:$8 sps:$4 sm:$0xff]   ;;  %v1255_v12 = vld [vmem:[#allocation2 + $0x14] ss:$8 sps:$4 sm:$0xff]   ;;  %v1257_v13 = vld [vmem:[#allocation2 + $0x10] ss:$8 sps:$4 sm:$0xff]  }
  0x42   :  { %v106_v14 = vld [vmem:[%s1649_s0 + $0x8] sm:$0xff]  ;;  %v1285_v17 = vld [vmem:[#allocation4 + $0x78] sm:$0xff]   ;;  %v1287_v19 = vld [vmem:[#allocation4 + $0x70] sm:$0xff]   ;;  %v1504_v52 = vmov 0.0   ;;  %v144_v54 = vshrl.u32 %v143_v53, 7  ;;  %vm1505_vm0 = vmmov 0  }
  0x43   :  { %316 = vmatpush1.bf16.msra.mxu0 %v1242_v3  ;;  %v1258_v15 = vld [vmem:[#allocation2 + $0x4] ss:$8 sps:$4 sm:$0xff]   ;;  %v141_v16 = vpack.c.bf16 %v106_v14, %v106_v14  ;;  %v1286_v18 = vld [vmem:[#allocation4 + $0x38] sm:$0xff]   ;;  %v1260_v20 = vld [vmem:[#allocation2] ss:$8 sps:$4 sm:$0xff]   ;;  %1174 = vmatprep.subr.bf16.mxu1 %v1285_v17 }
  0x44   :  { %317 = vmatprep.subr.bf16.mxu0 %v1243_v4  ;;  %1175 = vmatpush3.bf16.msra.mxu1 %v1286_v18  ;;  %v1288_v21 = vld [vmem:[#allocation4 + $0x30] sm:$0xff]   ;;  %v1289_v22 = vld [vmem:[#allocation4 + $0x68] sm:$0xff]   ;;  %v1291_v26 = vld [vmem:[#allocation4 + $0x60] sm:$0xff]   ;;  %v1597_v55 = vsub.s32 0, %v144_v54  ;;  %v1602_v57 = vsub.s32 1, %v144_v54 }
  0x45   :  { %345 = vmatprep.mubr.bf16.mxu0 %v141_v16  ;;  %1176 = vmatprep.subr.bf16.mxu1 %v1287_v19  ;;  %v1261_v23 = vld [vmem:[#allocation2 + $0xf4] ss:$8 sps:$4 sm:$0xff]   ;;  %v1263_v24 = vld [vmem:[#allocation2 + $0xf0] ss:$8 sps:$4 sm:$0xff]   ;;  %v1290_v25 = vld [vmem:[#allocation4 + $0x28] sm:$0xff]  }
  0x46   :  { %v1264_v27 = vld [vmem:[#allocation2 + $0xe4] ss:$8 sps:$4 sm:$0xff]   ;;  %v1266_v28 = vld [vmem:[#allocation2 + $0xe0] ss:$8 sps:$4 sm:$0xff]   ;;  %v1267_v30 = vld [vmem:[#allocation2 + $0xd4] ss:$8 sps:$4 sm:$0xff]  }
  0x47   :  { %318 = vmatpush1.bf16.msra.mxu0 %v1245_v5  ;;  %v1292_v29 = vld [vmem:[#allocation4 + $0x20] sm:$0xff]   ;;  %v1293_v31 = vld [vmem:[#allocation4 + $0x58] sm:$0xff]   ;;  %v1295_v34 = vld [vmem:[#allocation4 + $0x50] sm:$0xff]  }
  0x48   :  { %319 = vmatprep.subr.bf16.mxu0 %v1246_v6  ;;  %1177 = vmatpush3.bf16.msra.mxu1 %v1288_v21  ;;  %v1294_v32 = vld [vmem:[#allocation4 + $0x18] sm:$0xff]   ;;  %v1270_v35 = vld [vmem:[#allocation2 + $0xc4] ss:$8 sps:$4 sm:$0xff]   ;;  %v1296_v36 = vld [vmem:[#allocation4 + $0x10] sm:$0xff]  }
  0x49   :  { %1178 = vmatprep.subr.bf16.mxu1 %v1289_v22  ;;  %v1269_v33 = vld [vmem:[#allocation2 + $0xd0] ss:$8 sps:$4 sm:$0xff]   ;;  %v1272_v37 = vld [vmem:[#allocation2 + $0xc0] ss:$8 sps:$4 sm:$0xff]   ;;  %v1273_v38 = vld [vmem:[#allocation2 + $0xb4] ss:$8 sps:$4 sm:$0xff]  }
  0x4a   :  { %v1275_v39 = vld [vmem:[#allocation2 + $0xb0] ss:$8 sps:$4 sm:$0xff]   ;;  %v1276_v40 = vld [vmem:[#allocation2 + $0xa4] ss:$8 sps:$4 sm:$0xff]   ;;  %v1278_v41 = vld [vmem:[#allocation2 + $0xa0] ss:$8 sps:$4 sm:$0xff]  }
  0x4b   :  { %320 = vmatpush1.bf16.msra.mxu0 %v1248_v7  ;;  %v1279_v42 = vld [vmem:[#allocation2 + $0x94] ss:$8 sps:$4 sm:$0xff]   ;;  %v1281_v43 = vld [vmem:[#allocation2 + $0x90] ss:$8 sps:$4 sm:$0xff]   ;;  %v1282_v44 = vld [vmem:[#allocation2 + $0x84] ss:$8 sps:$4 sm:$0xff]  }
  0x4c   :  { %321 = vmatprep.subr.bf16.mxu0 %v1249_v8  ;;  %1179 = vmatpush3.bf16.msra.mxu1 %v1290_v25  ;;  %v1284_v45 = vld [vmem:[#allocation2 + $0x80] ss:$8 sps:$4 sm:$0xff]   ;;  %v1301_v5 = vld [vmem:[%s1654_s5 + $0x38] sm:$0xff]   ;;  %v1302_v7 = vld [vmem:[%s1654_s5 + $0x30] sm:$0xff]  }
  0x4d   :  { %1180 = vmatprep.subr.bf16.mxu1 %v1291_v26  ;;  %v105_v46 = vld [vmem:[%s1649_s0] sm:$0xff]  ;;  %v1297_v48 = vld [vmem:[#allocation4 + $0x48] sm:$0xff]   ;;  %v1309_v14 = vld [vmem:[#allocation7 + $0x70] ss:$8 sps:$4 sm:$0xff]  }
  0x4e   :  { %v140_v47 = vpack.c.bf16 %v105_v46, %v105_v46  ;;  %v1298_v49 = vld [vmem:[#allocation4 + $0x8] sm:$0xff]   ;;  %v1299_v50 = vld [vmem:[#allocation4 + $0x40] sm:$0xff]   ;;  %v1315_v19 = vld [vmem:[#allocation7 + $0x50] ss:$8 sps:$4 sm:$0xff]  }
  0x4f   :  { %322 = vmatpush1.bf16.msra.mxu0 %v1251_v9  ;;  %v1300_v51 = vld [vmem:[#allocation4] sm:$0xff]   ;;  %v1303_v8 = vld [vmem:[%s1654_s5 + $0x28] sm:$0xff]   ;;  %v1351_v53 = vld [vmem:[#allocation9 + $0x10] ss:$8 sps:$4 sm:$0xff]  }
  0x50   :  { %323 = vmatprep.subr.bf16.mxu0 %v1252_v10  ;;  %1181 = vmatpush3.bf16.msra.mxu1 %v1292_v29  ;;  %v139_v56 = vld [vmem:[%s1651_s2] sm:$0x3]  ;;  %v1305_v10 = vld [vmem:[%s1654_s5 + $0x18] sm:$0xff]   ;;  %v1314_v16 = vld [vmem:[#allocation7 + $0x64] ss:$8 sps:$4 sm:$0xff]  }
  0x51   :  { %1182 = vmatprep.subr.bf16.mxu1 %v1293_v31  ;;  %v146_v58 = vrot.slane %v139_v56, %v1597_v55  ;;  %v150_v59 = vrot.slane %v139_v56, %v1602_v57  ;;  %v1304_v9 = vld [vmem:[%s1654_s5 + $0x20] sm:$0xff]  }
  0x52   :  { %v1312_v17 = vld [vmem:[#allocation7 + $0x60] ss:$8 sps:$4 sm:$0xff]   ;;  %v1317_v18 = vld [vmem:[#allocation7 + $0x54] ss:$8 sps:$4 sm:$0xff]   ;;  %v1344_v46 = vld [vmem:[#allocation9 + $0x44] ss:$8 sps:$4 sm:$0xff]  }
  0x53   :  { %324 = vmatpush1.bf16.msra.mxu0 %v1254_v11  ;;  %v1306_v11 = vld [vmem:[%s1654_s5 + $0x10] sm:$0xff]   ;;  %v1318_v21 = vld [vmem:[#allocation7 + $0x40] ss:$8 sps:$4 sm:$0xff]   ;;  %v1098_v29 = vld [vmem:[#allocation6] ss:$0 sm:$0xff] }
  0x54   :  { %325 = vmatprep.subr.bf16.mxu0 %v1255_v12  ;;  %1183 = vmatpush3.bf16.msra.mxu1 %v1294_v32  ;;  %v1307_v12 = vld [vmem:[%s1654_s5 + $0x8] sm:$0xff]   ;;  %v1323_v22 = vld [vmem:[#allocation7 + $0x34] ss:$8 sps:$4 sm:$0xff]  }
  0x55   :  { %1184 = vmatprep.subr.bf16.mxu1 %v1295_v34  ;;  %v1324_v25 = vld [vmem:[#allocation7 + $0x20] ss:$8 sps:$4 sm:$0xff]   ;;  %v1329_v26 = vld [vmem:[#allocation7 + $0x14] ss:$8 sps:$4 sm:$0xff]   ;;  %v1356_v54 = vld [vmem:[#allocation9 + $0x4] ss:$8 sps:$4 sm:$0xff]  }
  0x56   :  { %v1354_v56 = vld [vmem:[#allocation9] ss:$8 sps:$4 sm:$0xff]  }
  0x57   :  { %326 = vmatpush1.bf16.msra.mxu0 %v1257_v13  ;;  %v1308_v13 = vld [vmem:[%s1654_s5] sm:$0xff]  }
  0x58   :  { %327 = vmatprep.subr.bf16.mxu0 %v1258_v15  ;;  %1185 = vmatpush3.bf16.msra.mxu1 %v1296_v36  ;;  %v1311_v15 = vld [vmem:[#allocation7 + $0x74] ss:$8 sps:$4 sm:$0xff]  }
  0x59   :  { %1186 = vmatprep.subr.bf16.mxu1 %v1297_v48  ;;  %v1347_v48 = vld [vmem:[#allocation9 + $0x34] ss:$8 sps:$4 sm:$0xff]  }
  0x5b   :  { %328 = vmatpush1.bf16.msra.mxu0 %v1260_v20  ;;  %v1320_v20 = vld [vmem:[#allocation7 + $0x44] ss:$8 sps:$4 sm:$0xff]  }
  0x5c   :  { %329 = vmatprep.subr.bf16.mxu0 %v1261_v23  ;;  %1187 = vmatpush3.bf16.msra.mxu1 %v1298_v49  ;;  %v1321_v23 = vld [vmem:[#allocation7 + $0x30] ss:$8 sps:$4 sm:$0xff]  }
  0x5d   :  { %1188 = vmatprep.subr.bf16.mxu1 %v1299_v50  ;;  %v1345_v49 = vld [vmem:[#allocation9 + $0x30] ss:$8 sps:$4 sm:$0xff]   ;;  %v1350_v50 = vld [vmem:[#allocation9 + $0x24] ss:$8 sps:$4 sm:$0xff]  }
  0x5f   :  { %330 = vmatpush2.bf16.msra.mxu0 %v1263_v24  ;;  %v1326_v24 = vld [vmem:[#allocation7 + $0x24] ss:$8 sps:$4 sm:$0xff]  }
  0x60   :  { %331 = vmatprep.subr.bf16.mxu0 %v1264_v27  ;;  %1189 = vmatpush3.bf16.msra.mxu1 %v1300_v51  ;;  %v1327_v27 = vld [vmem:[#allocation7 + $0x10] ss:$8 sps:$4 sm:$0xff]   ;;  %v1348_v51 = vld [vmem:[#allocation9 + $0x20] ss:$8 sps:$4 sm:$0xff]  }
  0x61   :  { %1205 = vmatprep.subr.bf16.mxu1 %v1504_v52 }
  0x63   :  { %332 = vmatpush2.bf16.msra.mxu0 %v1266_v28 }
  0x64   :  { %333 = vmatprep.subr.bf16.mxu0 %v1267_v30 }
  0x67   :  { %334 = vmatpush2.bf16.msra.mxu0 %v1269_v33 }
  0x68   :  { %335 = vmatprep.subr.bf16.mxu0 %v1270_v35 }
  0x6b   :  { %336 = vmatpush2.bf16.msra.mxu0 %v1272_v37  ;;  %v1332_v37 = vld [vmem:[#allocation7 + $0x4] ss:$8 sps:$4 sm:$0xff]  }
  0x6c   :  { %337 = vmatprep.subr.bf16.mxu0 %v1273_v38  ;;  %v1330_v38 = vld [vmem:[#allocation7] ss:$8 sps:$4 sm:$0xff]  }
  0x6f   :  { %338 = vmatpush2.bf16.msra.mxu0 %v1275_v39  ;;  %v1506_v39 = vmov 0  }
  0x70   :  { %339 = vmatprep.subr.bf16.mxu0 %v1276_v40  ;;  %v1333_v40 = vld [vmem:[#allocation9 + $0x70] ss:$8 sps:$4 sm:$0xff]  }
  0x73   :  { %340 = vmatpush2.bf16.msra.mxu0 %v1278_v41  ;;  %v1335_v41 = vld [vmem:[#allocation9 + $0x74] ss:$8 sps:$4 sm:$0xff]  }
  0x74   :  { %341 = vmatprep.subr.bf16.mxu0 %v1279_v42  ;;  %v1338_v42 = vld [vmem:[#allocation9 + $0x64] ss:$8 sps:$4 sm:$0xff]  }
  0x77   :  { %342 = vmatpush2.bf16.msra.mxu0 %v1281_v43  ;;  %v1336_v43 = vld [vmem:[#allocation9 + $0x60] ss:$8 sps:$4 sm:$0xff]  }
  0x78   :  { %343 = vmatprep.subr.bf16.mxu0 %v1282_v44  ;;  %v1341_v44 = vld [vmem:[#allocation9 + $0x54] ss:$8 sps:$4 sm:$0xff]  }
  0x7b   :  { %344 = vmatpush2.bf16.msra.mxu0 %v1284_v45  ;;  %v1339_v45 = vld [vmem:[#allocation9 + $0x50] ss:$8 sps:$4 sm:$0xff]  }
  0x7c   :  { %755 = vmatprep.subr.bf16.mxu0 %v1311_v15  ;;  %v1380_v15 = vld [vmem:[#allocation9 + $0x84] ss:$8 sps:$4 sm:$0xff]  }
  0x7e   :  { %346 = vmatmul.mubr.bf16.vlgmr.msra.gmra.mxu0 %v140_v47  ;;  %v1342_v47 = vld [vmem:[#allocation9 + $0x40] ss:$8 sps:$4 sm:$0xff]  }
  0x7f   :  { %756 = vmatpush1.bf16.msra.mxu0 %v1309_v14  ;;  %787 = vmatprep.mubr.bf16.mxu0 %v1506_v39  ;;  %v1375_v14 = vld [vmem:[#allocation9 + $0x90] ss:$8 sps:$4 sm:$0xff]  }
  0x80   :  { %757 = vmatprep.subr.bf16.mxu0 %v1314_v16  ;;  %v1378_v16 = vld [vmem:[#allocation9 + $0x80] ss:$8 sps:$4 sm:$0xff]  }
  0x83   :  { %758 = vmatpush1.bf16.msra.mxu0 %v1312_v17  ;;  %v662_v17 = vld [vmem:[%s1657_s8] sm:$0x3] }
  0x84   :  { %759 = vmatprep.subr.bf16.mxu0 %v1317_v18  ;;  %v668_v18 = vrot.slane %v662_v17, %v1597_v55 }
  0x87   :  { %760 = vmatpush1.bf16.msra.mxu0 %v1315_v19  ;;  %v672_v19 = vrot.slane %v662_v17, %v1602_v57 }
  0x88   :  { %761 = vmatprep.subr.bf16.mxu0 %v1320_v20 }
  0x8b   :  { %762 = vmatpush1.bf16.msra.mxu0 %v1318_v21 }
  0x8c   :  { %763 = vmatprep.subr.bf16.mxu0 %v1323_v22 }
  0x8f   :  { %764 = vmatpush1.bf16.msra.mxu0 %v1321_v23 }
  0x90   :  { %765 = vmatprep.subr.bf16.mxu0 %v1326_v24 }
  0x93   :  { %766 = vmatpush1.bf16.msra.mxu0 %v1324_v25 }
  0x94   :  { %767 = vmatprep.subr.bf16.mxu0 %v1329_v26 }
  0x97   :  { %768 = vmatpush1.bf16.msra.mxu0 %v1327_v27 }
  0x98   :  { %769 = vmatprep.subr.bf16.mxu0 %v1332_v37 }
  0x9b   :  { %770 = vmatpush1.bf16.msra.mxu0 %v1330_v38 }
 0x13e   :  { %v347_v60 = vpop.f32.mrf.mxu0 }
 0x13f   :  { %v348_v61 = vadd.f32 %v347_v60, %v146_v58  ;;  %v1359_v58 = vld [vmem:[#allocation9 + $0xf4] ss:$8 sps:$4 sm:$0xff]   ;;  %v1362_v60 = vld [vmem:[#allocation9 + $0xe4] ss:$8 sps:$4 sm:$0xff]  }
 0x140   :  { %v349_v62 = vpop.f32.mrf.mxu0 }
 0x141   :  { %v350_v63 = vadd.f32 %v349_v62, %v150_v59  ;;  %v354_v0 = vmax.f32 %v348_v61, 0.0  ;;  %v1357_v59 = vld [vmem:[#allocation9 + $0xf0] ss:$8 sps:$4 sm:$0xff]   ;;  %v1360_v61 = vld [vmem:[#allocation9 + $0xe0] ss:$8 sps:$4 sm:$0xff]  }
 0x142   :  { %v351_v1 = vpop.f32.mrf.mxu0  ;;  %v1365_v62 = vld [vmem:[#allocation9 + $0xd4] ss:$8 sps:$4 sm:$0xff]  }
 0x143   :  { %v355_v2 = vmax.f32 %v350_v63, 0.0  ;;  %v389_v6 = vpack.c.bf16 %v354_v0, %v354_v0  ;;  %v1363_v63 = vld [vmem:[#allocation9 + $0xd0] ss:$8 sps:$4 sm:$0xff]   ;;  %v1368_v0 = vld [vmem:[#allocation9 + $0xc4] ss:$8 sps:$4 sm:$0xff]  }
 0x144   :  { %v352_v3 = vpop.f32.mrf.mxu0  ;;  %v1366_v1 = vld [vmem:[#allocation9 + $0xc0] ss:$8 sps:$4 sm:$0xff]  }
 0x145   :  { %v390_v4 = vpack.c.bf16 %v355_v2, %v355_v2  ;;  %v1371_v2 = vld [vmem:[#allocation9 + $0xb4] ss:$8 sps:$4 sm:$0xff]   ;;  %v1369_v3 = vld [vmem:[#allocation9 + $0xb0] ss:$8 sps:$4 sm:$0xff]  }
 0x147   :  { %525 = vmatprep.mubr.bf16.mxu1 %v390_v4  ;;  %v1374_v4 = vld [vmem:[#allocation9 + $0xa4] ss:$8 sps:$4 sm:$0xff]  }
 0x148   :  { %526 = vmatmul.mubr.bf16.vlgmr.msra.gmra.mxu1 %v389_v6  ;;  %v1115_v6 = vld [vmem:[%s1655_s6] ss:$0 sm:$0xff] }
 0x149   :  { %1206 = vmatpush3.bf16.msra.mxu1 %v1301_v5  ;;  %1221 = vmatprep.mubr.msk.bf16.mxu1 %vm1505_vm0, %v1504_v52  ;;  %v1372_v5 = vld [vmem:[#allocation9 + $0xa0] ss:$8 sps:$4 sm:$0xff]  }
 0x14a   :  { %1207 = vmatprep.subr.bf16.mxu1 %v1504_v52 }
 0x14d   :  { %1208 = vmatpush3.bf16.msra.mxu1 %v1302_v7 }
 0x14e   :  { %1209 = vmatprep.subr.bf16.mxu1 %v1504_v52 }
 0x151   :  { %1210 = vmatpush3.bf16.msra.mxu1 %v1303_v8 }
 0x152   :  { %1211 = vmatprep.subr.bf16.mxu1 %v1504_v52 }
 0x155   :  { %1212 = vmatpush3.bf16.msra.mxu1 %v1304_v9 }
 0x156   :  { %1213 = vmatprep.subr.bf16.mxu1 %v1504_v52 }
 0x159   :  { %1214 = vmatpush3.bf16.msra.mxu1 %v1305_v10 }
 0x15a   :  { %1215 = vmatprep.subr.bf16.mxu1 %v1504_v52 }
 0x15d   :  { %1216 = vmatpush3.bf16.msra.mxu1 %v1306_v11 }
 0x15e   :  { %1217 = vmatprep.subr.bf16.mxu1 %v1504_v52 }
 0x161   :  { %1218 = vmatpush3.bf16.msra.mxu1 %v1307_v12 }
 0x162   :  { %1219 = vmatprep.subr.bf16.mxu1 %v1504_v52  ;;  %v1353_v52 = vld [vmem:[#allocation9 + $0x14] ss:$8 sps:$4 sm:$0xff]  }
 0x165   :  { %1220 = vmatpush3.bf16.msra.mxu1 %v1308_v13  ;;  %v1377_v13 = vld [vmem:[#allocation9 + $0x94] ss:$8 sps:$4 sm:$0xff]  }
 0x166   :  { %1004 = vmatprep.subr.bf16.mxu1 %v1335_v41 }
 0x208   :  { %v1190_v28 = vpop.f32.mrf.mxu1 }
 0x20a   :  { %v1191_v30 = vpop.f32.mrf.mxu1 }
 0x20b   :  { %v1192_v31 = vadd.f32 %v1191_v30, %v1190_v28  ;;  %v830_v30 = vld [vmem:[%s1659_s10] sm:$0x3] }
 0x20c   :  { %v1193_v32 = vpop.f32.mrf.mxu1 }
 0x20d   :  { %v528_v33 = vadd.f32 %v1192_v31, %v1098_v29  ;;  %v837_v31 = vrot.slane %v830_v30, %v1597_v55  ;;  %v841_v32 = vrot.slane %v830_v30, %v1602_v57 }
 0x20e   :  { %v1194_v34 = vpop.f32.mrf.mxu1 }
 0x20f   :  { %v533_v35 = vmax.f32 %v528_v33, 0.0 }
 0x211   :  { %v551_v36 = vpack.c.bf16 %v533_v35, %v533_v35 }
 0x213   :  { %1222 = vmatmul.mubr.bf16.vlgmr.msra.gmra.mxu1 %v551_v36 }
 0x214   :  { %1005 = vmatpush1.bf16.msra.mxu1 %v1333_v40 }
 0x215   :  { %1006 = vmatprep.subr.bf16.mxu1 %v1338_v42 }
 0x218   :  { %1007 = vmatpush1.bf16.msra.mxu1 %v1336_v43 }
 0x219   :  { %1008 = vmatprep.subr.bf16.mxu1 %v1341_v44 }
 0x21c   :  { %1009 = vmatpush1.bf16.msra.mxu1 %v1339_v45 }
 0x21d   :  { %1010 = vmatprep.subr.bf16.mxu1 %v1344_v46 }
 0x220   :  { %1011 = vmatpush1.bf16.msra.mxu1 %v1342_v47 }
 0x221   :  { %1012 = vmatprep.subr.bf16.mxu1 %v1347_v48 }
 0x224   :  { %1013 = vmatpush1.bf16.msra.mxu1 %v1345_v49 }
 0x225   :  { %1014 = vmatprep.subr.bf16.mxu1 %v1350_v50 }
 0x228   :  { %1015 = vmatpush1.bf16.msra.mxu1 %v1348_v51 }
 0x229   :  { %1016 = vmatprep.subr.bf16.mxu1 %v1353_v52 }
 0x22c   :  { %1017 = vmatpush1.bf16.msra.mxu1 %v1351_v53 }
 0x22d   :  { %1018 = vmatprep.subr.bf16.mxu1 %v1356_v54 }
 0x230   :  { %1019 = vmatpush1.bf16.msra.mxu1 %v1354_v56 }
 0x231   :  { %1020 = vmatprep.subr.bf16.mxu1 %v1359_v58 }
 0x234   :  { %1021 = vmatpush2.bf16.msra.mxu1 %v1357_v59 }
 0x235   :  { %1022 = vmatprep.subr.bf16.mxu1 %v1362_v60 }
 0x238   :  { %1023 = vmatpush2.bf16.msra.mxu1 %v1360_v61 }
 0x239   :  { %1024 = vmatprep.subr.bf16.mxu1 %v1365_v62 }
 0x23c   :  { %1025 = vmatpush2.bf16.msra.mxu1 %v1363_v63 }
 0x23d   :  { %1026 = vmatprep.subr.bf16.mxu1 %v1368_v0 }
 0x240   :  { %1027 = vmatpush2.bf16.msra.mxu1 %v1366_v1 }
 0x241   :  { %1028 = vmatprep.subr.bf16.mxu1 %v1371_v2 }
 0x244   :  { %1029 = vmatpush2.bf16.msra.mxu1 %v1369_v3 }
 0x245   :  { %1030 = vmatprep.subr.bf16.mxu1 %v1374_v4 }
 0x248   :  { %1031 = vmatpush2.bf16.msra.mxu1 %v1372_v5 }
 0x249   :  { %1032 = vmatprep.subr.bf16.mxu1 %v1377_v13 }
 0x24c   :  { %1033 = vmatpush2.bf16.msra.mxu1 %v1375_v14 }
 0x24d   :  { %1034 = vmatprep.subr.bf16.mxu1 %v1380_v15 }
 0x250   :  { %1035 = vmatpush2.bf16.msra.mxu1 %v1378_v16 }
 0x2d3   :  { %v640_v7 = vpop.f32.mrf.mxu1 }
 0x2d4   :  { %v641_v8 = vadd.f32 %v1115_v6, %v640_v7 }
 0x2d5   :  { %v1223_v9 = vpop.f32.mrf.mxu1 }
 0x2d6   :  { %v663_v10 = vpack.c.bf16 %v641_v8, %v641_v8 }
 0x2d7   :  { %v643_v11 = vpop.f32.mrf.mxu1 }
 0x2d8   :  { %788 = vmatmul.mubr.bf16.vlgmr.msra.gmra.mxu0 %v663_v10 }
 0x2d9   :  { %v1224_v12 = vpop.f32.mrf.mxu1 }
 0x398   :  { %v789_v20 = vpop.f32.mrf.mxu0 }
 0x399   :  { %v790_v21 = vadd.f32 %v789_v20, %v668_v18 }
 0x39a   :  { %v791_v22 = vpop.f32.mrf.mxu0 }
 0x39b   :  { %v792_v23 = vadd.f32 %v791_v22, %v672_v19  ;;  %v796_v24 = vmax.f32 %v790_v21, 0.0 }
 0x39c   :  { %v793_v25 = vpop.f32.mrf.mxu0 }
 0x39d   :  { %v797_v26 = vmax.f32 %v792_v23, 0.0  ;;  %v831_v29 = vpack.c.bf16 %v796_v24, %v796_v24 }
 0x39e   :  { %v794_v27 = vpop.f32.mrf.mxu0 }
 0x39f   :  { %v832_v28 = vpack.c.bf16 %v797_v26, %v797_v26 }
 0x3a1   :  { %1036 = vmatprep.mubr.bf16.mxu1 %v832_v28 }
 0x3a2   :  { %1037 = vmatmul.mubr.bf16.vlgmr.msra.gmra.mxu1 %v831_v29 }
 0x462   :  { %v1038_v33 = vpop.f32.mrf.mxu1 }
 0x463   :  { %v1039_v34 = vadd.f32 %v1038_v33, %v837_v31 }
 0x464   :  { %v1040_v35 = vpop.f32.mrf.mxu1 }
 0x465   :  { %v1172_v36 = vmul.f32 -1.442695, %v1039_v34  ;;  %v1041_v37 = vadd.f32 %v1040_v35, %v841_v32 }
 0x466   :  { %v1042_v38 = vpop.f32.mrf.mxu1 }
 0x467   :  { %1381 = vpow2.f32 %v1172_v36  ;;  %v1173_v39 = vmul.f32 -1.442695, %v1041_v37 }
 0x468   :  { %v1043_v40 = vpop.f32.mrf.mxu1 }
 0x469   :  { %1383 = vpow2.f32 %v1173_v39 }
 0x474   :  { %v1382_v41 = vpop.eup %1381 }
 0x475   :  { %v1051_v42 = vadd.f32 1.0, %v1382_v41 }
 0x476   :  { %v1384_v43 = vpop.eup %1383 }
 0x477   :  { %1385 = vrcp.f32 %v1051_v42  ;;  %v1052_v44 = vadd.f32 1.0, %v1384_v43 }
 0x479   :  { %1387 = vrcp.f32 %v1052_v44 }
 0x484   :  { %v1386_v45 = vpop.eup %1385 }
 0x485   :  { %1057 = vst [vmem:[%s1660_s11] sm:$0xff] %v1386_v45 }
 0x486   :  { %v1388_v55 = vpop.eup %1387 }
 0x487   :  { %1058 = vst [vmem:[%s1660_s11 + $0x8] sm:$0xff] %v1388_v55 }
 0x488   :  { %1063 = vsyncpa [#allocation3], 1 }
 0x489   :  { %1064 = vsyncpa [#allocation5], 1 }
 0x48a   :  { %1065 = vsyncpa [#allocation8], 1 }

</bundles_post_ra>
